<compile_context>
chip_gen: v7x
topology: tpu7x:2x2x1
jax: 0.10.0
libtpu: 0.0.40
codegen_flags: <defaults>
</compile_context>

<pallas_src>
import jax
import jax.numpy as jnp
from jax.experimental import pallas as pl
from jax.experimental.pallas import tpu as pltpu


def _policy_kernel(x_ref, w1_ref, b1_ref, w2_ref, b2_ref, out_ref):
    x = x_ref[...]                                               # (tb, n_states)

    # affine1: x @ W1 + b1  (MXU, f32 accumulate) then ReLU
    h = jnp.dot(x, w1_ref[...], preferred_element_type=jnp.float32)
    h = jnp.maximum(h + b1_ref[...], 0.0)                        # (tb, n_hidden)

    # affine2: h @ W2 + b2   (narrow N = n_actions; MXU pads internally)
    s = jnp.dot(h, w2_ref[...], preferred_element_type=jnp.float32)
    s = s + b2_ref[...]                                          # (tb, n_actions)

    # Numerically stable softmax over the real action lanes only.  Exact divide
    # so rows sum to 1 within f32 precision (approx reciprocal was the previous
    # correctness failure and probabilities may feed a categorical sampler).
    s = s - jnp.max(s, axis=-1, keepdims=True)
    e = jnp.exp(s)
    out_ref[...] = e / jnp.sum(e, axis=-1, keepdims=True)


def policy_forward(x, w1, b1, w2, b2, *, tile_b=4096):
    """x: (B, n_states) f32; w1: (n_states, n_hidden); b1: (1, n_hidden);
    w2: (n_hidden, n_actions); b2: (1, n_actions).
    Returns (B, n_actions) action probabilities."""
    B, n_states = x.shape
    n_hidden = w1.shape[1]
    n_actions = w2.shape[1]

    # Batch tile: multiple of 8 sublanes, large (default 4096) to amortize the
    # ~0.35 us grid-step overhead, but capped at ~ceil(B/2) so large batches
    # always produce >= 2 grid steps for v7x's two TensorCores.
    half = -(-B // 2)                               # cdiv(B, 2)
    tb = max(8, min(tile_b, ((half + 7) // 8) * 8))
    b_pad = ((B + tb - 1) // tb) * tb
    x_p = x if b_pad == B else jnp.pad(x, ((0, b_pad - B), (0, 0)))

    grid = (b_pad // tb,)
    out = pl.pallas_call(
        _policy_kernel,
        out_shape=jax.ShapeDtypeStruct((b_pad, n_actions), jnp.float32),
        grid=grid,
        in_specs=[
            pl.BlockSpec((tb, n_states), lambda i: (i, 0)),        # x: batch-tiled
            pl.BlockSpec((n_states, n_hidden), lambda i: (0, 0)),  # W1: resident
            pl.BlockSpec((1, n_hidden), lambda i: (0, 0)),         # b1: resident
            pl.BlockSpec((n_hidden, n_actions), lambda i: (0, 0)), # W2: resident
            pl.BlockSpec((1, n_actions), lambda i: (0, 0)),        # b2: resident
        ],
        # Compact output: last block dim == full array dim (n_actions), so the
        # spec is legal and HBM writeback is only the useful 4 lanes per row.
        out_specs=pl.BlockSpec((tb, n_actions), lambda i: (i, 0)),
        compiler_params=pltpu.CompilerParams(
            dimension_semantics=("parallel",),      # shard batch steps across TCs
        ),
    )(x_p, w1, b1, w2, b2)

    return out if b_pad == B else out[:B]


def init_params(key, n_states, n_hidden, n_actions):
    """Deterministic init mimicking PyTorch nn.Linear default U(-1/sqrt(fan_in), +)."""
    k1, k2, k3, k4 = jax.random.split(key, 4)
    lim1 = 1.0 / jnp.sqrt(jnp.float32(n_states))
    lim2 = 1.0 / jnp.sqrt(jnp.float32(n_hidden))
    w1 = jax.random.uniform(k1, (n_states, n_hidden), jnp.float32, -lim1, lim1)
    b1 = jax.random.uniform(k2, (1, n_hidden), jnp.float32, -lim1, lim1)
    w2 = jax.random.uniform(k3, (n_hidden, n_actions), jnp.float32, -lim2, lim2)
    b2 = jax.random.uniform(k4, (1, n_actions), jnp.float32, -lim2, lim2)
    return w1, b1, w2, b2


def _reference(x, w1, b1, w2, b2):
    # Plain-JAX reference at full f32 precision (TPU default dot precision is
    # lower, which would dominate the comparison error otherwise).
    h = jnp.maximum(jnp.dot(x, w1, precision=jax.lax.Precision.HIGHEST) + b1, 0.0)
    s = jnp.dot(h, w2, precision=jax.lax.Precision.HIGHEST) + b2
    return jax.nn.softmax(s, axis=-1)


if __name__ == "__main__":
    # Shapes consistent with the module: n_states=8,
    # n_hidden=128 (Config.Policy.hidden_size), n_actions=4, batch=2.
    B, n_states, n_hidden, n_actions = 2, 8, 128, 4

    key = jax.random.PRNGKey(0)
    kx, kp = jax.random.split(key)
    x = jax.random.normal(kx, (B, n_states), jnp.float32)
    w1, b1, w2, b2 = init_params(kp, n_states, n_hidden, n_actions)

    probs = jax.block_until_ready(policy_forward(x, w1, b1, w2, b2))
    ref = _reference(x, w1, b1, w2, b2)
    assert probs.shape == (B, n_actions)
    assert jnp.allclose(probs, ref, atol=1e-4, rtol=1e-4)
    assert jnp.allclose(jnp.sum(probs, axis=-1), 1.0, atol=1e-5)

    # Slightly larger, non-multiple-of-8 batch to exercise padding + a
    # multi-step grid on the same kernel.
    xb = jax.random.normal(jax.random.PRNGKey(1), (33, n_states), jnp.float32)
    pb = jax.block_until_ready(policy_forward(xb, w1, b1, w2, b2))
    refb = _reference(xb, w1, b1, w2, b2)
    assert pb.shape == (33, n_actions)
    assert jnp.allclose(pb, refb, atol=1e-4, rtol=1e-4)

    print("KERNEL_OK")
</pallas_src>

<mosaic_0001>
module attributes {stable_mosaic.version = 11 : i64} {
  func.func @_policy_kernel(%arg0: i32, %arg1: memref<8x8xf32, #tpu.memory_space<vmem>>, %arg2: memref<8x128xf32, #tpu.memory_space<vmem>>, %arg3: memref<1x128xf32, #tpu.memory_space<vmem>>, %arg4: memref<128x4xf32, #tpu.memory_space<vmem>>, %arg5: memref<1x4xf32, #tpu.memory_space<vmem>>, %arg6: memref<8x4xf32, #tpu.memory_space<vmem>>) attributes {dimension_semantics = [#tpu.dimension_semantics<parallel>], iteration_bounds = array<i64: 1>, scalar_prefetch = 0 : i64, scratch_operands = 0 : i64, tpu.core_type = #tpu.core_type<tc>, window_params = [{transform_indices = @transform_0, window_bounds = array<i64: 8, 8>}, {pipeline_mode = #tpu.pipeline_mode<synchronous>, transform_indices = @transform_1, window_bounds = array<i64: 8, 128>}, {pipeline_mode = #tpu.pipeline_mode<synchronous>, transform_indices = @transform_2, window_bounds = array<i64: 1, 128>}, {pipeline_mode = #tpu.pipeline_mode<synchronous>, transform_indices = @transform_3, window_bounds = array<i64: 128, 4>}, {pipeline_mode = #tpu.pipeline_mode<synchronous>, transform_indices = @transform_4, window_bounds = array<i64: 1, 4>}, {transform_indices = @transform_5, window_bounds = array<i64: 8, 4>}]} {
    %c0 = arith.constant 0 : index
    %c0_0 = arith.constant 0 : index
    %0 = vector.load %arg1[%c0, %c0_0] : memref<8x8xf32, #tpu.memory_space<vmem>>, vector<8x8xf32>
    %c0_1 = arith.constant 0 : index
    %c0_2 = arith.constant 0 : index
    %1 = vector.load %arg2[%c0_1, %c0_2] : memref<8x128xf32, #tpu.memory_space<vmem>>, vector<8x128xf32>
    %cst = arith.constant dense<0.000000e+00> : vector<8x128xf32>
    %2 = tpu.matmul %0, %1, %cst {dimension_numbers = #tpu.dot_dimension_numbers<[1], [0], [0], [1], [0, 0, 1, 1], [], []>} : vector<8x8xf32>, vector<8x128xf32>, vector<8x128xf32> -> vector<8x128xf32>
    %c0_3 = arith.constant 0 : index
    %c0_4 = arith.constant 0 : index
    %3 = vector.load %arg3[%c0_3, %c0_4] : memref<1x128xf32, #tpu.memory_space<vmem>>, vector<1x128xf32>
    %4 = vector.broadcast %3 : vector<1x128xf32> to vector<8x128xf32>
    %5 = arith.addf %2, %4 : vector<8x128xf32>
    %cst_5 = arith.constant 0.000000e+00 : f32
    %6 = vector.broadcast %cst_5 : f32 to vector<8x128xf32>
    %7 = arith.maximumf %5, %6 : vector<8x128xf32>
    %c0_6 = arith.constant 0 : index
    %c0_7 = arith.constant 0 : index
    %8 = vector.load %arg4[%c0_6, %c0_7] : memref<128x4xf32, #tpu.memory_space<vmem>>, vector<128x4xf32>
    %cst_8 = arith.constant dense<0.000000e+00> : vector<8x4xf32>
    %9 = tpu.matmul %7, %8, %cst_8 {dimension_numbers = #tpu.dot_dimension_numbers<[1], [0], [0], [1], [0, 0, 1, 1], [], []>} : vector<8x128xf32>, vector<128x4xf32>, vector<8x4xf32> -> vector<8x4xf32>
    %c0_9 = arith.constant 0 : index
    %c0_10 = arith.constant 0 : index
    %10 = vector.load %arg5[%c0_9, %c0_10] : memref<1x4xf32, #tpu.memory_space<vmem>>, vector<1x4xf32>
    %11 = vector.broadcast %10 : vector<1x4xf32> to vector<8x4xf32>
    %12 = arith.addf %9, %11 : vector<8x4xf32>
    %cst_11 = arith.constant dense<0xFF800000> : vector<8xf32>
    %13 = vector.multi_reduction <maximumf>, %12, %cst_11 [1] : vector<8x4xf32> to vector<8xf32>
    %14 = vector.shape_cast %13 : vector<8xf32> to vector<8x1xf32>
    %15 = vector.broadcast %14 : vector<8x1xf32> to vector<8x4xf32>
    %16 = arith.subf %12, %15 : vector<8x4xf32>
    %17 = math.exp %16 : vector<8x4xf32>
    %cst_12 = arith.constant dense<0.000000e+00> : vector<8xf32>
    %18 = vector.multi_reduction <add>, %17, %cst_12 [1] : vector<8x4xf32> to vector<8xf32>
    %19 = vector.shape_cast %18 : vector<8xf32> to vector<8x1xf32>
    %20 = vector.broadcast %19 : vector<8x1xf32> to vector<8x4xf32>
    %21 = arith.divf %17, %20 : vector<8x4xf32>
    %c0_13 = arith.constant 0 : index
    %c0_14 = arith.constant 0 : index
    %22 = vector.load %arg6[%c0_13, %c0_14] : memref<8x4xf32, #tpu.memory_space<vmem>>, vector<8x4xf32>
    tpu.vector_store %arg6[%c0_13, %c0_14], %21 {strides = array<i32>} : memref<8x4xf32, #tpu.memory_space<vmem>>, vector<8x4xf32>,
    return
  }
  func.func @transform_0(%arg0: i32) -> (i32, i32) {
    %c0_i32 = arith.constant 0 : i32
    %c0_i32_0 = arith.constant 0 : i32
    return %arg0, %c0_i32 : i32, i32
  }
  func.func @transform_1(%arg0: i32) -> (i32, i32) {
    %c0_i32 = arith.constant 0 : i32
    %c0_i32_0 = arith.constant 0 : i32
    %c0_i32_1 = arith.constant 0 : i32
    return %c0_i32, %c0_i32_0 : i32, i32
  }
  func.func @transform_2(%arg0: i32) -> (i32, i32) {
    %c0_i32 = arith.constant 0 : i32
    %c0_i32_0 = arith.constant 0 : i32
    %c0_i32_1 = arith.constant 0 : i32
    return %c0_i32, %c0_i32_0 : i32, i32
  }
  func.func @transform_3(%arg0: i32) -> (i32, i32) {
    %c0_i32 = arith.constant 0 : i32
    %c0_i32_0 = arith.constant 0 : i32
    %c0_i32_1 = arith.constant 0 : i32
    return %c0_i32, %c0_i32_0 : i32, i32
  }
  func.func @transform_4(%arg0: i32) -> (i32, i32) {
    %c0_i32 = arith.constant 0 : i32
    %c0_i32_0 = arith.constant 0 : i32
    %c0_i32_1 = arith.constant 0 : i32
    return %c0_i32, %c0_i32_0 : i32, i32
  }
  func.func @transform_5(%arg0: i32) -> (i32, i32) {
    %c0_i32 = arith.constant 0 : i32
    %c0_i32_0 = arith.constant 0 : i32
    return %arg0, %c0_i32 : i32, i32
  }
}

</mosaic_0001>

<bundles_post_ra>
// kernel: tpu_custom_call.1
= control target key start
LH: loop header
LB: loop body
LE: loop exit
PB: predicated region body
PF: predicated region fallthrough
CT: control target
= control target key end

     0   :  { %vm29_vm0 = vcmask 64512   ;;  %v307_v0 = vmov 0.0   ;;  %vm308_vm1 = vmmov 0   ;;  %v309_v4 = vmov 0.0|0.0   ;;  %s406_s1 = inlined_call_operand.vmem [shape: f32[8,128], index: 1, kind: input, shape index: {}]   ;;  %s407_s0 = inlined_call_operand.vmem [shape: f32[8,8], index: 0, kind: input, shape index: {}]   ;;  %s408_s3 = inlined_call_operand.vmem [shape: f32[128,4], index: 3, kind: input, shape index: {}]   ;;  %s409_s2 = inlined_call_operand.vmem [shape: f32[1,128], index: 2, kind: input, shape index: {}]   ;;  %s410_s4 = inlined_call_operand.vmem [shape: f32[1,4], index: 4, kind: input, shape index: {}]   ;;  %s411_s5 = inlined_call_operand.vmem [shape: f32[8,4], index: 5, kind: output, shape index: {}]  }
   0x1   :  { %236 = vmatprep.subr.mxu0 %v307_v0  ;;  %v21_v1 = vld [vmem:[%s406_s1] sm:$0xff]  ;;  %238 = vmatprep.mubr.msk.f32.mxu0 %vm308_vm1, %v307_v0  ;;  %v105_v5 = vld [vmem:[%s408_s3 + $0x8] sm:$0xff]  ;;  %v106_v6 = vld [vmem:[%s408_s3 + $0x10] sm:$0xff]  ;;  %vm197_vm2 = vcmask 31744  }
   0x2   :  { %v20_v2 = vld [vmem:[%s407_s0] sm:$0xff]  ;;  %237 = vmatpush3.msra.mxu0 %v21_v1  ;;  %276 = vmatprep.subr.bf16.mxu1 %v309_v4  ;;  %v107_v7 = vld [vmem:[%s408_s3 + $0x18] sm:$0xff]  ;;  %v109_v11 = vld [vmem:[%s408_s3 + $0x28] sm:$0xff] }
   0x3   :  { %v104_v3 = vld [vmem:[%s408_s3] sm:$0xff]  ;;  %239 = vmatmul.mubr.msk.f32.vlgmr.msra.gmra.mrb[0].mxu0 %vm29_vm0, %v20_v2  ;;  %273 = vmatprep.mubr.msk.f32.mxu1 %vm308_vm1, %v307_v0  ;;  %v280_v9 = vpack.c.bf16 %v107_v7, %v106_v6  ;;  %v110_v13 = vld [vmem:[%s408_s3 + $0x30] sm:$0xff]  ;;  %v111_v14 = vld [vmem:[%s408_s3 + $0x38] sm:$0xff] }
   0x4   :  { %v277_v8 = vpack.c.bf16 %v105_v5, %v104_v3  ;;  %v108_v10 = vld [vmem:[%s408_s3 + $0x20] sm:$0xff]  ;;  %v286_v15 = vpack.c.bf16 %v111_v14, %v110_v13  ;;  %v113_v17 = vld [vmem:[%s408_s3 + $0x48] sm:$0xff]  ;;  %v114_v19 = vld [vmem:[%s408_s3 + $0x50] sm:$0xff] }
   0x5   :  { %v283_v12 = vpack.c.bf16 %v109_v11, %v108_v10  ;;  %v112_v16 = vld [vmem:[%s408_s3 + $0x40] sm:$0xff]  ;;  %v115_v20 = vld [vmem:[%s408_s3 + $0x58] sm:$0xff]  ;;  %v117_v23 = vld [vmem:[%s408_s3 + $0x68] sm:$0xff] }
   0x6   :  { %278 = vmatpush3.bf16.msra.mxu1 %v277_v8  ;;  %v289_v18 = vpack.c.bf16 %v113_v17, %v112_v16  ;;  %v292_v21 = vpack.c.bf16 %v115_v20, %v114_v19  ;;  %v116_v22 = vld [vmem:[%s408_s3 + $0x60] sm:$0xff]  ;;  %v118_v25 = vld [vmem:[%s408_s3 + $0x70] sm:$0xff]  ;;  %v119_v26 = vld [vmem:[%s408_s3 + $0x78] sm:$0xff] }
   0x7   :  { %279 = vmatprep.subr.bf16.mxu1 %v309_v4  ;;  %v295_v24 = vpack.c.bf16 %v117_v23, %v116_v22  ;;  %v298_v27 = vpack.c.bf16 %v119_v26, %v118_v25  ;;  %v214_v28 = vld [vmem:[%s409_s2] ss:$0 sm:$0xff] }
   0x8   :  { %v216_v33 = vld [vmem:[%s410_s4] ss:$0 sm:$0xff] }
   0xa   :  { %281 = vmatpush3.bf16.msra.mxu1 %v280_v9 }
   0xb   :  { %282 = vmatprep.subr.bf16.mxu1 %v309_v4 }
   0xe   :  { %284 = vmatpush3.bf16.msra.mxu1 %v283_v12 }
   0xf   :  { %285 = vmatprep.subr.bf16.mxu1 %v309_v4 }
  0x12   :  { %287 = vmatpush3.bf16.msra.mxu1 %v286_v15 }
  0x13   :  { %288 = vmatprep.subr.bf16.mxu1 %v309_v4 }
  0x16   :  { %290 = vmatpush3.bf16.msra.mxu1 %v289_v18 }
  0x17   :  { %291 = vmatprep.subr.bf16.mxu1 %v309_v4 }
  0x1a   :  { %293 = vmatpush3.bf16.msra.mxu1 %v292_v21 }
  0x1b   :  { %294 = vmatprep.subr.bf16.mxu1 %v309_v4 }
  0x1e   :  { %296 = vmatpush3.bf16.msra.mxu1 %v295_v24 }
  0x1f   :  { %297 = vmatprep.subr.bf16.mxu1 %v309_v4 }
  0x22   :  { %299 = vmatpush3.bf16.msra.mxu1 %v298_v27 }
  0xd6   :  { %v99_v29 = vpop.f32.mrb[0].mxu0 }
  0xd7   :  { %v100_v30 = vadd.f32 %v214_v28, %v99_v29  ;;  %v240_v31 = vpop.f32.mrb[1].mxu0 }
  0xd9   :  { %v103_v32 = vmax.f32 %v100_v30, 0.0 }
  0xdb   :  { %274 = vmatmul.mubr.f32.vlgmr.msra.gmra.mrb[0].mxu1 %v103_v32 }
 0x1ae   :  { %v193_v34 = vpop.f32.mrb[0].mxu1 }
 0x1af   :  { %v194_v35 = vadd.f32 %v216_v33, %v193_v34  ;;  %v275_v36 = vpop.f32.mrb[1].mxu1 }
 0x1b1   :  { %v198_v37 = vsel %vm197_vm2, %v194_v35, -inf }
 0x1b2   :  { %199 = vmax.xlane.f32.xlu0 %v198_v37 }
 0x23f   :  { %v200_v38 = vpop.xlane.xlu0 %199 }
 0x240   :  { %v201_v39 = vsub.f32 %v194_v35, %v200_v38 }
 0x242   :  { %v202_v40 = vmul.f32 1.442695, %v201_v39 }
 0x244   :  { %303 = vpow2.f32 %v202_v40 }
 0x24e   :  { %v304_v41 = vpop.eup %303 }
 0x24f   :  { %v204_v42 = vsel %vm197_vm2, %v304_v41, 0.0 }
 0x250   :  { %205 = vadd.xlane.f32.xlu0 %v204_v42 }
 0x2dd   :  { %v206_v43 = vpop.xlane.xlu0 %205 }
 0x2de   :  { %305 = vrcp.f32 %v206_v43 }
 0x2e8   :  { %v306_v44 = vpop.eup %305 }
 0x2e9   :  { %v208_v45 = vmul.f32 %v306_v44, %v304_v41 }
 0x2eb   :  { %209 = vst.msk [vmem:[%s411_s5] sm:$0xff] %vm197_vm2, %v208_v45 }

</bundles_post_ra>
